<compile_context>
chip_gen: v7x
topology: tpu7x:2x2x1
jax: 0.10.0
libtpu: 0.0.40
codegen_flags: <defaults>
</compile_context>

<pallas_src>
import math

import jax
import jax.numpy as jnp
import numpy as np
from jax.experimental import pallas as pl
from jax.experimental.pallas import tpu as pltpu


# ---------------------------------------------------------------------------
# Kernel
# ---------------------------------------------------------------------------

def make_encoder_kernel(n_heads, d_model, d_ff, eps=1e-6):
    d_k = d_model // n_heads
    scale = 1.0 / math.sqrt(d_k)

    def layer_norm(z, a, b):
        # torch-style: a * (z - mean) / (std + eps) + b, std unbiased (ddof=1)
        mean = jnp.mean(z, axis=-1, keepdims=True)
        var = jnp.sum((z - mean) ** 2, axis=-1, keepdims=True) * (1.0 / (d_model - 1))
        inv = pl.reciprocal(jnp.sqrt(var) + eps, approx=True)
        return a * (z - mean) * inv + b

    def kernel(mask_ref, x_ref,
               w_qkv_ref, b_qkv_ref, w_o_ref, b_o_ref,
               w1_ref, b1_ref, w2_ref, b2_ref,
               ln_ref, lnf_ref,
               out_ref, x_carry):
        l = pl.program_id(1)
        n_l = pl.num_programs(1)
        S = x_ref.shape[1]

        # ---- initialize the residual-stream carry at the first layer of each batch ----
        @pl.when(l == 0)
        def _():
            x_carry[...] = x_ref[0]

        x = x_carry[...]                         # (S, D) f32 running activations
        mask_bias = mask_ref[0]                  # (1, S) additive key-mask bias (0 / -1e9)

        # ---- this layer's weights (streamed one layer per grid step) ----
        w_qkv = w_qkv_ref[0]                     # (D, 3D) bf16
        b_qkv = b_qkv_ref[0]                     # (1, 3D) f32
        w_o, b_o = w_o_ref[0], b_o_ref[0]        # (D, D) bf16, (1, D) f32
        w_1, b_1 = w1_ref[0], b1_ref[0]          # (D, Dff) bf16, (1, Dff) f32
        w_2, b_2 = w2_ref[0], b2_ref[0]          # (Dff, D) bf16, (1, D) f32
        ln_p = ln_ref[0]                         # (4, D) f32: ln1a, ln1b, ln2a, ln2b

        # ================= self-attention sublayer: x + Attn(LN(x)) =================
        xn = layer_norm(x, ln_p[0:1, :], ln_p[1:2, :])
        qkv = jnp.dot(xn.astype(jnp.bfloat16), w_qkv,
                      preferred_element_type=jnp.float32) + b_qkv       # (S, 3D) f32
        q = (qkv[:, :d_model] * scale).astype(jnp.bfloat16)             # scale folded into Q
        k = qkv[:, d_model:2 * d_model].astype(jnp.bfloat16)
        v = qkv[:, 2 * d_model:].astype(jnp.bfloat16)

        if n_heads == 1:
            # single-head fast path: plain 2-D MXU matmuls, no head relayouts
            scores = jax.lax.dot_general(q, k, (((1,), (1,)), ((), ())),
                                         preferred_element_type=jnp.float32)  # (S, S)
            scores = scores + mask_bias          # masks KEY positions
            m = jnp.max(scores, axis=-1, keepdims=True)
            e = jnp.exp(scores - m)
            p = e * pl.reciprocal(jnp.sum(e, axis=-1, keepdims=True), approx=True)
            ctx = jnp.dot(p.astype(jnp.bfloat16), v,
                          preferred_element_type=jnp.float32)            # (S, D)
        else:
            # head-batched attention (no per-head Python loop, no concatenate)
            qh = q.reshape(S, n_heads, d_k)
            kh = k.reshape(S, n_heads, d_k)
            vh = v.reshape(S, n_heads, d_k)
            scores = jnp.einsum('qhd,khd->hqk', qh, kh,
                                preferred_element_type=jnp.float32)      # (H, S, S)
            scores = scores + mask_bias          # (1,S) broadcasts over heads & queries
            m = jnp.max(scores, axis=-1, keepdims=True)
            e = jnp.exp(scores - m)
            p = e * pl.reciprocal(jnp.sum(e, axis=-1, keepdims=True), approx=True)
            ctx = jnp.einsum('hqk,khd->qhd', p.astype(jnp.bfloat16), vh,
                             preferred_element_type=jnp.float32)         # (S, H, d_k)
            ctx = ctx.reshape(S, d_model)

        att = jnp.dot(ctx.astype(jnp.bfloat16), w_o,
                      preferred_element_type=jnp.float32) + b_o
        x = x + att                              # dropout == identity (eval)

        # ================= feed-forward sublayer: x + FFN(LN(x)) =================
        xn = layer_norm(x, ln_p[2:3, :], ln_p[3:4, :])
        h = jnp.dot(xn.astype(jnp.bfloat16), w_1,
                    preferred_element_type=jnp.float32) + b_1
        h = jnp.maximum(h, 0.0)
        ff = jnp.dot(h.astype(jnp.bfloat16), w_2,
                     preferred_element_type=jnp.float32) + b_2
        x = x + ff

        x_carry[...] = x

        # ---- final LayerNorm of the whole encoder, after the last layer ----
        @pl.when(l == n_l - 1)
        def _():
            lnf = lnf_ref[...]                   # (2, D)
            out_ref[0] = layer_norm(x, lnf[0:1, :], lnf[1:2, :])

    return kernel


def _vmem_limit_bytes(S, D, Dff, H):
    """Rough VMEM budget: double-buffered streamed layer weights + I/O blocks + intermediates."""
    bf16, f32 = 2, 4
    weights = 2 * bf16 * (3 * D * D + D * D + D * Dff + Dff * D)     # one layer, x2 buffers
    small = 2 * f32 * (3 * D + D + Dff + D + 4 * D) + f32 * 2 * D    # biases + LN params
    io = 2 * f32 * (2 * S * D) + f32 * S * D + 2 * f32 * S           # x/out blocks + carry + mask
    interm = 3 * f32 * (3 * S * D + 2 * H * S * S + S * Dff + 2 * S * D)  # qkv/scores/ffn (+fudge)
    est = weights + small + io + interm
    return int(min(96 * 2 ** 20, max(2 * est, 32 * 2 ** 20)))


def transformer_encoder_pallas(x, mask, params, *, n_layers, n_heads, d_model, d_ff, eps=1e-6):
    """x: (B, S, D) f32;  mask: (B, S), nonzero = visible key, 0 = masked key."""
    B, S, D = x.shape
    assert D == d_model and d_model % n_heads == 0
    Dff, D3 = d_ff, 3 * d_model
    kernel = make_encoder_kernel(n_heads, d_model, d_ff, eps)

    # Precompute the additive key-mask bias once (0 where visible, -1e9 where masked).
    mask_bias = jnp.where(mask != 0, 0.0, -1e9).astype(jnp.float32).reshape(B, 1, S)

    # bf16 weights for the MXU (f32 accumulation in-kernel); biases / LN params stay f32.
    w_qkv = params['w_qkv'].astype(jnp.bfloat16)
    w_o = params['w_o'].astype(jnp.bfloat16)
    w_1 = params['w_1'].astype(jnp.bfloat16)
    w_2 = params['w_2'].astype(jnp.bfloat16)

    in_specs = [
        pl.BlockSpec((1, 1, S), lambda b, l: (b, 0, 0)),      # mask bias (per batch)
        pl.BlockSpec((1, S, D), lambda b, l: (b, 0, 0)),      # x (resident across layer axis)
        pl.BlockSpec((1, D, D3), lambda b, l: (l, 0, 0)),     # w_qkv  (layer-streamed)
        pl.BlockSpec((1, 1, D3), lambda b, l: (l, 0, 0)),     # b_qkv
        pl.BlockSpec((1, D, D), lambda b, l: (l, 0, 0)),      # w_o
        pl.BlockSpec((1, 1, D), lambda b, l: (l, 0, 0)),      # b_o
        pl.BlockSpec((1, D, Dff), lambda b, l: (l, 0, 0)),    # w_1
        pl.BlockSpec((1, 1, Dff), lambda b, l: (l, 0, 0)),    # b_1
        pl.BlockSpec((1, Dff, D), lambda b, l: (l, 0, 0)),    # w_2
        pl.BlockSpec((1, 1, D), lambda b, l: (l, 0, 0)),      # b_2
        pl.BlockSpec((1, 4, D), lambda b, l: (l, 0, 0)),      # ln1a/ln1b/ln2a/ln2b
        pl.BlockSpec((2, D), lambda b, l: (0, 0)),            # final LayerNorm a/b
    ]

    out = pl.pallas_call(
        kernel,
        out_shape=jax.ShapeDtypeStruct((B, S, D), jnp.float32),
        grid_spec=pltpu.PrefetchScalarGridSpec(
            num_scalar_prefetch=0,
            grid=(B, n_layers),
            in_specs=in_specs,
            out_specs=pl.BlockSpec((1, S, D), lambda b, l: (b, 0, 0)),
            scratch_shapes=[pltpu.VMEM((S, D), jnp.float32)],   # residual-stream carry
        ),
        compiler_params=pltpu.CompilerParams(
            dimension_semantics=("parallel", "arbitrary"),
            vmem_limit_bytes=_vmem_limit_bytes(S, D, Dff, n_heads),
        ),
    )(mask_bias, x, w_qkv, params['b_qkv'], w_o, params['b_o'],
      w_1, params['b_1'], w_2, params['b_2'], params['ln'], params['ln_f'])
    return out


# ---------------------------------------------------------------------------
# Parameter init (deterministic, packed per-layer stacks) and pure-JAX reference
# ---------------------------------------------------------------------------

def init_params(key, n_layers, d_model, d_ff):
    def xavier(k, shape):
        fan_in, fan_out = shape
        limit = math.sqrt(6.0 / (fan_in + fan_out))
        return jax.random.uniform(k, shape, jnp.float32, -limit, limit)

    stacks = {k: [] for k in
              ('w_qkv', 'b_qkv', 'w_o', 'b_o', 'w_1', 'b_1', 'w_2', 'b_2', 'ln')}
    for _ in range(n_layers):
        key, *ks = jax.random.split(key, 16)
        wq = xavier(ks[0], (d_model, d_model))
        wk = xavier(ks[1], (d_model, d_model))
        wv = xavier(ks[2], (d_model, d_model))
        stacks['w_qkv'].append(jnp.concatenate([wq, wk, wv], axis=1))
        stacks['b_qkv'].append(jax.random.uniform(ks[3], (1, 3 * d_model), jnp.float32, -0.1, 0.1))
        stacks['w_o'].append(xavier(ks[4], (d_model, d_model)))
        stacks['b_o'].append(jax.random.uniform(ks[5], (1, d_model), jnp.float32, -0.1, 0.1))
        stacks['w_1'].append(xavier(ks[6], (d_model, d_ff)))
        stacks['b_1'].append(jax.random.uniform(ks[7], (1, d_ff), jnp.float32, -0.1, 0.1))
        stacks['w_2'].append(xavier(ks[8], (d_ff, d_model)))
        stacks['b_2'].append(jax.random.uniform(ks[9], (1, d_model), jnp.float32, -0.1, 0.1))
        ln1a = 1.0 + jax.random.uniform(ks[10], (d_model,), jnp.float32, -0.1, 0.1)
        ln1b = jax.random.uniform(ks[11], (d_model,), jnp.float32, -0.05, 0.05)
        ln2a = 1.0 + jax.random.uniform(ks[12], (d_model,), jnp.float32, -0.1, 0.1)
        ln2b = jax.random.uniform(ks[13], (d_model,), jnp.float32, -0.05, 0.05)
        stacks['ln'].append(jnp.stack([ln1a, ln1b, ln2a, ln2b], axis=0))

    key, ka, kb = jax.random.split(key, 3)
    lnf_a = 1.0 + jax.random.uniform(ka, (d_model,), jnp.float32, -0.1, 0.1)
    lnf_b = jax.random.uniform(kb, (d_model,), jnp.float32, -0.05, 0.05)

    params = {k: jnp.stack(v) for k, v in stacks.items()}
    params['ln_f'] = jnp.stack([lnf_a, lnf_b], axis=0)
    return params


def transformer_encoder_ref(x, mask, params, *, n_layers, n_heads, d_model, d_ff, eps=1e-6):
    d_k = d_model // n_heads
    B, S, _ = x.shape

    def ln(z, a, b):
        mean = jnp.mean(z, axis=-1, keepdims=True)
        var = jnp.sum((z - mean) ** 2, axis=-1, keepdims=True) / (d_model - 1)
        return a * (z - mean) / (jnp.sqrt(var) + eps) + b

    keep = (mask != 0)[:, None, None, :]                        # (B, 1, 1, S)
    for l in range(n_layers):
        ln1a, ln1b, ln2a, ln2b = params['ln'][l]
        xn = ln(x, ln1a, ln1b)
        qkv = xn @ params['w_qkv'][l] + params['b_qkv'][l]
        q, k, v = jnp.split(qkv, 3, axis=-1)

        def heads(t):
            return t.reshape(B, S, n_heads, d_k).transpose(0, 2, 1, 3)

        qh, kh, vh = heads(q), heads(k), heads(v)
        scores = jnp.einsum('bhqd,bhkd->bhqk', qh, kh) / math.sqrt(d_k)
        scores = jnp.where(keep, scores, -1e9)
        attn = jax.nn.softmax(scores, axis=-1)
        ctx = jnp.einsum('bhqk,bhkd->bhqd', attn, vh)
        ctx = ctx.transpose(0, 2, 1, 3).reshape(B, S, d_model)
        x = x + (ctx @ params['w_o'][l] + params['b_o'][l])
        xn = ln(x, ln2a, ln2b)
        x = x + (jnp.maximum(xn @ params['w_1'][l] + params['b_1'][l], 0.0)
                 @ params['w_2'][l] + params['b_2'][l])
    lnf_a, lnf_b = params['ln_f']
    return ln(x, lnf_a, lnf_b)


# ---------------------------------------------------------------------------
# Main
# ---------------------------------------------------------------------------

if __name__ == "__main__":
    key = jax.random.PRNGKey(0)

    configs = [
        # module defaults (n_heads=1, n_layers=1), tiny feature dims
        dict(B=2, S=8, d_model=32, d_ff=64, n_heads=1, n_layers=1),
        # lane-dense, multi-head, multi-layer config exercising the layer-streaming path
        dict(B=2, S=16, d_model=128, d_ff=256, n_heads=4, n_layers=2),
    ]

    for cfg in configs:
        key, kx, kp = jax.random.split(key, 3)
        B, S = cfg['B'], cfg['S']
        D, Dff, H, L = cfg['d_model'], cfg['d_ff'], cfg['n_heads'], cfg['n_layers']

        x = jax.random.normal(kx, (B, S, D), jnp.float32)
        # mask: batch 0 fully visible; batch 1 has the last 2 key positions masked out
        pos = jnp.arange(S)
        mask = jnp.stack([jnp.ones((S,), jnp.int32),
                          (pos < S - 2).astype(jnp.int32)], axis=0)      # (B, S)

        params = init_params(kp, L, D, Dff)

        out = jax.block_until_ready(transformer_encoder_pallas(
            x, mask, params, n_layers=L, n_heads=H, d_model=D, d_ff=Dff))
        ref = transformer_encoder_ref(
            x, mask, params, n_layers=L, n_heads=H, d_model=D, d_ff=Dff)

        # tolerance accounts for bf16 MXU operands + approx (EUP) reciprocals in the kernel
        np.testing.assert_allclose(np.asarray(out), np.asarray(ref), rtol=5e-2, atol=5e-2)

    print("KERNEL_OK")
</pallas_src>

<mosaic_0001>
module attributes {stable_mosaic.version = 11 : i64} {
  func.func @kernel(%arg0: i32, %arg1: i32, %arg2: memref<1x1x8xf32, #tpu.memory_space<vmem>>, %arg3: memref<1x8x32xf32, #tpu.memory_space<vmem>>, %arg4: memref<1x32x96xbf16, #tpu.memory_space<vmem>>, %arg5: memref<1x1x96xf32, #tpu.memory_space<vmem>>, %arg6: memref<1x32x32xbf16, #tpu.memory_space<vmem>>, %arg7: memref<1x1x32xf32, #tpu.memory_space<vmem>>, %arg8: memref<1x32x64xbf16, #tpu.memory_space<vmem>>, %arg9: memref<1x1x64xf32, #tpu.memory_space<vmem>>, %arg10: memref<1x64x32xbf16, #tpu.memory_space<vmem>>, %arg11: memref<1x1x32xf32, #tpu.memory_space<vmem>>, %arg12: memref<1x4x32xf32, #tpu.memory_space<vmem>>, %arg13: memref<2x32xf32, #tpu.memory_space<vmem>>, %arg14: memref<1x8x32xf32, #tpu.memory_space<vmem>>, %arg15: memref<8x32xf32, #tpu.memory_space<vmem>>) attributes {dimension_semantics = [#tpu.dimension_semantics<parallel>, #tpu.dimension_semantics<arbitrary>], iteration_bounds = array<i64: 2, 1>, scalar_prefetch = 0 : i64, scratch_operands = 1 : i64, tpu.core_type = #tpu.core_type<tc>, window_params = [{transform_indices = @transform_0, window_bounds = array<i64: 1, 1, 8>}, {transform_indices = @transform_1, window_bounds = array<i64: 1, 8, 32>}, {transform_indices = @transform_2, window_bounds = array<i64: 1, 32, 96>}, {transform_indices = @transform_3, window_bounds = array<i64: 1, 1, 96>}, {transform_indices = @transform_4, window_bounds = array<i64: 1, 32, 32>}, {transform_indices = @transform_5, window_bounds = array<i64: 1, 1, 32>}, {transform_indices = @transform_6, window_bounds = array<i64: 1, 32, 64>}, {transform_indices = @transform_7, window_bounds = array<i64: 1, 1, 64>}, {transform_indices = @transform_8, window_bounds = array<i64: 1, 64, 32>}, {transform_indices = @transform_9, window_bounds = array<i64: 1, 1, 32>}, {transform_indices = @transform_10, window_bounds = array<i64: 1, 4, 32>}, {pipeline_mode = #tpu.pipeline_mode<synchronous>, transform_indices = @transform_11, window_bounds = array<i64: 2, 32>}, {transform_indices = @transform_12, window_bounds = array<i64: 1, 8, 32>}]} {
    %c0_i32 = arith.constant 0 : i32
    %0 = arith.cmpi eq, %arg1, %c0_i32 : i32
    %1 = arith.extui %0 : i1 to i32
    %c0_i32_0 = arith.constant 0 : i32
    %2 = arith.cmpi ne, %1, %c0_i32_0 : i32
    scf.if %2 {
      %c0_55 = arith.constant 0 : index
      %c0_56 = arith.constant 0 : index
      %c0_57 = arith.constant 0 : index
      %121 = vector.load %arg3[%c0_55, %c0_56, %c0_57] : memref<1x8x32xf32, #tpu.memory_space<vmem>>, vector<1x8x32xf32>
      %122 = vector.shape_cast %121 : vector<1x8x32xf32> to vector<8x32xf32>
      %c0_58 = arith.constant 0 : index
      %c0_59 = arith.constant 0 : index
      %123 = vector.load %arg15[%c0_58, %c0_59] : memref<8x32xf32, #tpu.memory_space<vmem>>, vector<8x32xf32>
      tpu.vector_store %arg15[%c0_58, %c0_59], %122 {strides = array<i32>} : memref<8x32xf32, #tpu.memory_space<vmem>>, vector<8x32xf32>,
    } else {
    }
    %c0 = arith.constant 0 : index
    %c0_1 = arith.constant 0 : index
    %3 = vector.load %arg15[%c0, %c0_1] : memref<8x32xf32, #tpu.memory_space<vmem>>, vector<8x32xf32>
    %c0_2 = arith.constant 0 : index
    %c0_3 = arith.constant 0 : index
    %c0_4 = arith.constant 0 : index
    %4 = vector.load %arg2[%c0_2, %c0_3, %c0_4] : memref<1x1x8xf32, #tpu.memory_space<vmem>>, vector<1x1x8xf32>
    %5 = vector.shape_cast %4 : vector<1x1x8xf32> to vector<1x8xf32>
    %c0_5 = arith.constant 0 : index
    %c0_6 = arith.constant 0 : index
    %c0_7 = arith.constant 0 : index
    %6 = vector.load %arg4[%c0_5, %c0_6, %c0_7] : memref<1x32x96xbf16, #tpu.memory_space<vmem>>, vector<1x32x96xbf16>
    %7 = vector.shape_cast %6 : vector<1x32x96xbf16> to vector<32x96xbf16>
    %c0_8 = arith.constant 0 : index
    %c0_9 = arith.constant 0 : index
    %c0_10 = arith.constant 0 : index
    %8 = vector.load %arg5[%c0_8, %c0_9, %c0_10] : memref<1x1x96xf32, #tpu.memory_space<vmem>>, vector<1x1x96xf32>
    %9 = vector.shape_cast %8 : vector<1x1x96xf32> to vector<1x96xf32>
    %c0_11 = arith.constant 0 : index
    %c0_12 = arith.constant 0 : index
    %c0_13 = arith.constant 0 : index
    %10 = vector.load %arg6[%c0_11, %c0_12, %c0_13] : memref<1x32x32xbf16, #tpu.memory_space<vmem>>, vector<1x32x32xbf16>
    %11 = vector.shape_cast %10 : vector<1x32x32xbf16> to vector<32x32xbf16>
    %c0_14 = arith.constant 0 : index
    %c0_15 = arith.constant 0 : index
    %c0_16 = arith.constant 0 : index
    %12 = vector.load %arg7[%c0_14, %c0_15, %c0_16] : memref<1x1x32xf32, #tpu.memory_space<vmem>>, vector<1x1x32xf32>
    %13 = vector.shape_cast %12 : vector<1x1x32xf32> to vector<1x32xf32>
    %c0_17 = arith.constant 0 : index
    %c0_18 = arith.constant 0 : index
    %c0_19 = arith.constant 0 : index
    %14 = vector.load %arg8[%c0_17, %c0_18, %c0_19] : memref<1x32x64xbf16, #tpu.memory_space<vmem>>, vector<1x32x64xbf16>
    %15 = vector.shape_cast %14 : vector<1x32x64xbf16> to vector<32x64xbf16>
    %c0_20 = arith.constant 0 : index
    %c0_21 = arith.constant 0 : index
    %c0_22 = arith.constant 0 : index
    %16 = vector.load %arg9[%c0_20, %c0_21, %c0_22] : memref<1x1x64xf32, #tpu.memory_space<vmem>>, vector<1x1x64xf32>
    %17 = vector.shape_cast %16 : vector<1x1x64xf32> to vector<1x64xf32>
    %c0_23 = arith.constant 0 : index
    %c0_24 = arith.constant 0 : index
    %c0_25 = arith.constant 0 : index
    %18 = vector.load %arg10[%c0_23, %c0_24, %c0_25] : memref<1x64x32xbf16, #tpu.memory_space<vmem>>, vector<1x64x32xbf16>
    %19 = vector.shape_cast %18 : vector<1x64x32xbf16> to vector<64x32xbf16>
    %c0_26 = arith.constant 0 : index
    %c0_27 = arith.constant 0 : index
    %c0_28 = arith.constant 0 : index
    %20 = vector.load %arg11[%c0_26, %c0_27, %c0_28] : memref<1x1x32xf32, #tpu.memory_space<vmem>>, vector<1x1x32xf32>
    %21 = vector.shape_cast %20 : vector<1x1x32xf32> to vector<1x32xf32>
    %c0_29 = arith.constant 0 : index
    %c0_30 = arith.constant 0 : index
    %c0_31 = arith.constant 0 : index
    %22 = vector.load %arg12[%c0_29, %c0_30, %c0_31] : memref<1x4x32xf32, #tpu.memory_space<vmem>>, vector<1x4x32xf32>
    %23 = vector.shape_cast %22 : vector<1x4x32xf32> to vector<4x32xf32>
    %24 = vector.extract_strided_slice %23 {offsets = [0, 0], sizes = [1, 32], strides = [1, 1]} : vector<4x32xf32> to vector<1x32xf32>
    %25 = vector.extract_strided_slice %23 {offsets = [1, 0], sizes = [1, 32], strides = [1, 1]} : vector<4x32xf32> to vector<1x32xf32>
    %cst = arith.constant dense<0.000000e+00> : vector<8xf32>
    %26 = vector.multi_reduction <add>, %3, %cst [1] : vector<8x32xf32> to vector<8xf32>
    %27 = vector.shape_cast %26 : vector<8xf32> to vector<8x1xf32>
    %cst_32 = arith.constant 3.200000e+01 : f32
    %28 = vector.broadcast %cst_32 : f32 to vector<8x1xf32>
    %29 = arith.divf %27, %28 : vector<8x1xf32>
    %30 = vector.broadcast %29 : vector<8x1xf32> to vector<8x32xf32>
    %31 = arith.subf %3, %30 : vector<8x32xf32>
    %32 = arith.mulf %31, %31 : vector<8x32xf32>
    %cst_33 = arith.constant dense<0.000000e+00> : vector<8xf32>
    %33 = vector.multi_reduction <add>, %32, %cst_33 [1] : vector<8x32xf32> to vector<8xf32>
    %34 = vector.shape_cast %33 : vector<8xf32> to vector<8x1xf32>
    %cst_34 = arith.constant 0.0322580636 : f32
    %35 = vector.broadcast %cst_34 : f32 to vector<8x1xf32>
    %36 = arith.mulf %34, %35 : vector<8x1xf32>
    %37 = math.sqrt %36 : vector<8x1xf32>
    %cst_35 = arith.constant 9.99999997E-7 : f32
    %38 = vector.broadcast %cst_35 : f32 to vector<8x1xf32>
    %39 = arith.addf %37, %38 : vector<8x1xf32>
    %40 = tpu.reciprocal %39 {approx = true} : vector<8x1xf32> -> vector<8x1xf32>
    %41 = vector.broadcast %29 : vector<8x1xf32> to vector<8x32xf32>
    %42 = arith.subf %3, %41 : vector<8x32xf32>
    %43 = vector.broadcast %24 : vector<1x32xf32> to vector<8x32xf32>
    %44 = arith.mulf %43, %42 : vector<8x32xf32>
    %45 = vector.broadcast %40 : vector<8x1xf32> to vector<8x32xf32>
    %46 = arith.mulf %44, %45 : vector<8x32xf32>
    %47 = vector.broadcast %25 : vector<1x32xf32> to vector<8x32xf32>
    %48 = arith.addf %46, %47 : vector<8x32xf32>
    %49 = arith.truncf %48 : vector<8x32xf32> to vector<8x32xbf16>
    %cst_36 = arith.constant dense<0.000000e+00> : vector<8x96xf32>
    %50 = tpu.matmul %49, %7, %cst_36 {dimension_numbers = #tpu.dot_dimension_numbers<[1], [0], [0], [1], [0, 0, 1, 1], [], []>} : vector<8x32xbf16>, vector<32x96xbf16>, vector<8x96xf32> -> vector<8x96xf32>
    %51 = vector.broadcast %9 : vector<1x96xf32> to vector<8x96xf32>
    %52 = arith.addf %50, %51 : vector<8x96xf32>
    %53 = vector.extract_strided_slice %52 {offsets = [0, 0], sizes = [8, 32], strides = [1, 1]} : vector<8x96xf32> to vector<8x32xf32>
    %cst_37 = arith.constant 0.176776692 : f32
    %54 = vector.broadcast %cst_37 : f32 to vector<8x32xf32>
    %55 = arith.mulf %53, %54 : vector<8x32xf32>
    %56 = arith.truncf %55 : vector<8x32xf32> to vector<8x32xbf16>
    %57 = vector.extract_strided_slice %52 {offsets = [0, 32], sizes = [8, 32], strides = [1, 1]} : vector<8x96xf32> to vector<8x32xf32>
    %58 = arith.truncf %57 : vector<8x32xf32> to vector<8x32xbf16>
    %59 = vector.extract_strided_slice %52 {offsets = [0, 64], sizes = [8, 32], strides = [1, 1]} : vector<8x96xf32> to vector<8x32xf32>
    %60 = arith.truncf %59 : vector<8x32xf32> to vector<8x32xbf16>
    %cst_38 = arith.constant dense<0.000000e+00> : vector<8x8xf32>
    %61 = tpu.matmul %56, %58, %cst_38 {dimension_numbers = #tpu.dot_dimension_numbers<[1], [1], [0], [0], [0, 0, 1, 0], [], []>} : vector<8x32xbf16>, vector<8x32xbf16>, vector<8x8xf32> -> vector<8x8xf32>
    %62 = vector.broadcast %5 : vector<1x8xf32> to vector<8x8xf32>
    %63 = arith.addf %61, %62 : vector<8x8xf32>
    %cst_39 = arith.constant dense<0xFF800000> : vector<8xf32>
    %64 = vector.multi_reduction <maximumf>, %63, %cst_39 [1] : vector<8x8xf32> to vector<8xf32>
    %65 = vector.shape_cast %64 : vector<8xf32> to vector<8x1xf32>
    %66 = vector.broadcast %65 : vector<8x1xf32> to vector<8x8xf32>
    %67 = arith.subf %63, %66 : vector<8x8xf32>
    %68 = math.exp %67 : vector<8x8xf32>
    %cst_40 = arith.constant dense<0.000000e+00> : vector<8xf32>
    %69 = vector.multi_reduction <add>, %68, %cst_40 [1] : vector<8x8xf32> to vector<8xf32>
    %70 = vector.shape_cast %69 : vector<8xf32> to vector<8x1xf32>
    %71 = tpu.reciprocal %70 {approx = true} : vector<8x1xf32> -> vector<8x1xf32>
    %72 = vector.broadcast %71 : vector<8x1xf32> to vector<8x8xf32>
    %73 = arith.mulf %68, %72 : vector<8x8xf32>
    %74 = arith.truncf %73 : vector<8x8xf32> to vector<8x8xbf16>
    %cst_41 = arith.constant dense<0.000000e+00> : vector<8x32xf32>
    %75 = tpu.matmul %74, %60, %cst_41 {dimension_numbers = #tpu.dot_dimension_numbers<[1], [0], [0], [1], [0, 0, 1, 1], [], []>} : vector<8x8xbf16>, vector<8x32xbf16>, vector<8x32xf32> -> vector<8x32xf32>
    %76 = arith.truncf %75 : vector<8x32xf32> to vector<8x32xbf16>
    %cst_42 = arith.constant dense<0.000000e+00> : vector<8x32xf32>
    %77 = tpu.matmul %76, %11, %cst_42 {dimension_numbers = #tpu.dot_dimension_numbers<[1], [0], [0], [1], [0, 0, 1, 1], [], []>} : vector<8x32xbf16>, vector<32x32xbf16>, vector<8x32xf32> -> vector<8x32xf32>
    %78 = vector.broadcast %13 : vector<1x32xf32> to vector<8x32xf32>
    %79 = arith.addf %77, %78 : vector<8x32xf32>
    %80 = arith.addf %3, %79 : vector<8x32xf32>
    %81 = vector.extract_strided_slice %23 {offsets = [2, 0], sizes = [1, 32], strides = [1, 1]} : vector<4x32xf32> to vector<1x32xf32>
    %82 = vector.extract_strided_slice %23 {offsets = [3, 0], sizes = [1, 32], strides = [1, 1]} : vector<4x32xf32> to vector<1x32xf32>
    %cst_43 = arith.constant dense<0.000000e+00> : vector<8xf32>
    %83 = vector.multi_reduction <add>, %80, %cst_43 [1] : vector<8x32xf32> to vector<8xf32>
    %84 = vector.shape_cast %83 : vector<8xf32> to vector<8x1xf32>
    %cst_44 = arith.constant 3.200000e+01 : f32
    %85 = vector.broadcast %cst_44 : f32 to vector<8x1xf32>
    %86 = arith.divf %84, %85 : vector<8x1xf32>
    %87 = vector.broadcast %86 : vector<8x1xf32> to vector<8x32xf32>
    %88 = arith.subf %80, %87 : vector<8x32xf32>
    %89 = arith.mulf %88, %88 : vector<8x32xf32>
    %cst_45 = arith.constant dense<0.000000e+00> : vector<8xf32>
    %90 = vector.multi_reduction <add>, %89, %cst_45 [1] : vector<8x32xf32> to vector<8xf32>
    %91 = vector.shape_cast %90 : vector<8xf32> to vector<8x1xf32>
    %cst_46 = arith.constant 0.0322580636 : f32
    %92 = vector.broadcast %cst_46 : f32 to vector<8x1xf32>
    %93 = arith.mulf %91, %92 : vector<8x1xf32>
    %94 = math.sqrt %93 : vector<8x1xf32>
    %cst_47 = arith.constant 9.99999997E-7 : f32
    %95 = vector.broadcast %cst_47 : f32 to vector<8x1xf32>
    %96 = arith.addf %94, %95 : vector<8x1xf32>
    %97 = tpu.reciprocal %96 {approx = true} : vector<8x1xf32> -> vector<8x1xf32>
    %98 = vector.broadcast %86 : vector<8x1xf32> to vector<8x32xf32>
    %99 = arith.subf %80, %98 : vector<8x32xf32>
    %100 = vector.broadcast %81 : vector<1x32xf32> to vector<8x32xf32>
    %101 = arith.mulf %100, %99 : vector<8x32xf32>
    %102 = vector.broadcast %97 : vector<8x1xf32> to vector<8x32xf32>
    %103 = arith.mulf %101, %102 : vector<8x32xf32>
    %104 = vector.broadcast %82 : vector<1x32xf32> to vector<8x32xf32>
    %105 = arith.addf %103, %104 : vector<8x32xf32>
    %106 = arith.truncf %105 : vector<8x32xf32> to vector<8x32xbf16>
    %cst_48 = arith.constant dense<0.000000e+00> : vector<8x64xf32>
    %107 = tpu.matmul %106, %15, %cst_48 {dimension_numbers = #tpu.dot_dimension_numbers<[1], [0], [0], [1], [0, 0, 1, 1], [], []>} : vector<8x32xbf16>, vector<32x64xbf16>, vector<8x64xf32> -> vector<8x64xf32>
    %108 = vector.broadcast %17 : vector<1x64xf32> to vector<8x64xf32>
    %109 = arith.addf %107, %108 : vector<8x64xf32>
    %cst_49 = arith.constant 0.000000e+00 : f32
    %110 = vector.broadcast %cst_49 : f32 to vector<8x64xf32>
    %111 = arith.maximumf %109, %110 : vector<8x64xf32>
    %112 = arith.truncf %111 : vector<8x64xf32> to vector<8x64xbf16>
    %cst_50 = arith.constant dense<0.000000e+00> : vector<8x32xf32>
    %113 = tpu.matmul %112, %19, %cst_50 {dimension_numbers = #tpu.dot_dimension_numbers<[1], [0], [0], [1], [0, 0, 1, 1], [], []>} : vector<8x64xbf16>, vector<64x32xbf16>, vector<8x32xf32> -> vector<8x32xf32>
    %114 = vector.broadcast %21 : vector<1x32xf32> to vector<8x32xf32>
    %115 = arith.addf %113, %114 : vector<8x32xf32>
    %116 = arith.addf %80, %115 : vector<8x32xf32>
    %c0_51 = arith.constant 0 : index
    %c0_52 = arith.constant 0 : index
    %117 = vector.load %arg15[%c0_51, %c0_52] : memref<8x32xf32, #tpu.memory_space<vmem>>, vector<8x32xf32>
    tpu.vector_store %arg15[%c0_51, %c0_52], %116 {strides = array<i32>} : memref<8x32xf32, #tpu.memory_space<vmem>>, vector<8x32xf32>,
    %c0_i32_53 = arith.constant 0 : i32
    %118 = arith.cmpi eq, %arg1, %c0_i32_53 : i32
    %119 = arith.extui %118 : i1 to i32
    %c0_i32_54 = arith.constant 0 : i32
    %120 = arith.cmpi ne, %119, %c0_i32_54 : i32
    scf.if %120 {
      %c0_55 = arith.constant 0 : index
      %c0_56 = arith.constant 0 : index
      %121 = vector.load %arg13[%c0_55, %c0_56] : memref<2x32xf32, #tpu.memory_space<vmem>>, vector<2x32xf32>
      %122 = vector.extract_strided_slice %121 {offsets = [0, 0], sizes = [1, 32], strides = [1, 1]} : vector<2x32xf32> to vector<1x32xf32>
      %123 = vector.extract_strided_slice %121 {offsets = [1, 0], sizes = [1, 32], strides = [1, 1]} : vector<2x32xf32> to vector<1x32xf32>
      %cst_57 = arith.constant dense<0.000000e+00> : vector<8xf32>
      %124 = vector.multi_reduction <add>, %116, %cst_57 [1] : vector<8x32xf32> to vector<8xf32>
      %125 = vector.shape_cast %124 : vector<8xf32> to vector<8x1xf32>
      %cst_58 = arith.constant 3.200000e+01 : f32
      %126 = vector.broadcast %cst_58 : f32 to vector<8x1xf32>
      %127 = arith.divf %125, %126 : vector<8x1xf32>
      %128 = vector.broadcast %127 : vector<8x1xf32> to vector<8x32xf32>
      %129 = arith.subf %116, %128 : vector<8x32xf32>
      %130 = arith.mulf %129, %129 : vector<8x32xf32>
      %cst_59 = arith.constant dense<0.000000e+00> : vector<8xf32>
      %131 = vector.multi_reduction <add>, %130, %cst_59 [1] : vector<8x32xf32> to vector<8xf32>
      %132 = vector.shape_cast %131 : vector<8xf32> to vector<8x1xf32>
      %cst_60 = arith.constant 0.0322580636 : f32
      %133 = vector.broadcast %cst_60 : f32 to vector<8x1xf32>
      %134 = arith.mulf %132, %133 : vector<8x1xf32>
      %135 = math.sqrt %134 : vector<8x1xf32>
      %cst_61 = arith.constant 9.99999997E-7 : f32
      %136 = vector.broadcast %cst_61 : f32 to vector<8x1xf32>
      %137 = arith.addf %135, %136 : vector<8x1xf32>
      %138 = tpu.reciprocal %137 {approx = true} : vector<8x1xf32> -> vector<8x1xf32>
      %139 = vector.broadcast %127 : vector<8x1xf32> to vector<8x32xf32>
      %140 = arith.subf %116, %139 : vector<8x32xf32>
      %141 = vector.broadcast %122 : vector<1x32xf32> to vector<8x32xf32>
      %142 = arith.mulf %141, %140 : vector<8x32xf32>
      %143 = vector.broadcast %138 : vector<8x1xf32> to vector<8x32xf32>
      %144 = arith.mulf %142, %143 : vector<8x32xf32>
      %145 = vector.broadcast %123 : vector<1x32xf32> to vector<8x32xf32>
      %146 = arith.addf %144, %145 : vector<8x32xf32>
      %c0_62 = arith.constant 0 : index
      %c0_63 = arith.constant 0 : index
      %c0_64 = arith.constant 0 : index
      %147 = vector.load %arg14[%c0_62, %c0_63, %c0_64] : memref<1x8x32xf32, #tpu.memory_space<vmem>>, vector<1x8x32xf32>
      %148 = vector.shape_cast %147 : vector<1x8x32xf32> to vector<8x32xf32>
      %149 = vector.shape_cast %146 : vector<8x32xf32> to vector<1x8x32xf32>
      tpu.vector_store %arg14[%c0_62, %c0_63, %c0_64], %149 {strides = array<i32>} : memref<1x8x32xf32, #tpu.memory_space<vmem>>, vector<1x8x32xf32>,
    } else {
    }
    return
  }
  func.func @transform_0(%arg0: i32, %arg1: i32) -> (i32, i32, i32) {
    %c0_i32 = arith.constant 0 : i32
    %c0_i32_0 = arith.constant 0 : i32
    %c0_i32_1 = arith.constant 0 : i32
    return %arg0, %c0_i32, %c0_i32_0 : i32, i32, i32
  }
  func.func @transform_1(%arg0: i32, %arg1: i32) -> (i32, i32, i32) {
    %c0_i32 = arith.constant 0 : i32
    %c0_i32_0 = arith.constant 0 : i32
    %c0_i32_1 = arith.constant 0 : i32
    return %arg0, %c0_i32, %c0_i32_0 : i32, i32, i32
  }
  func.func @transform_2(%arg0: i32, %arg1: i32) -> (i32, i32, i32) {
    %c0_i32 = arith.constant 0 : i32
    %c0_i32_0 = arith.constant 0 : i32
    %c0_i32_1 = arith.constant 0 : i32
    return %arg1, %c0_i32, %c0_i32_0 : i32, i32, i32
  }
  func.func @transform_3(%arg0: i32, %arg1: i32) -> (i32, i32, i32) {
    %c0_i32 = arith.constant 0 : i32
    %c0_i32_0 = arith.constant 0 : i32
    %c0_i32_1 = arith.constant 0 : i32
    return %arg1, %c0_i32, %c0_i32_0 : i32, i32, i32
  }
  func.func @transform_4(%arg0: i32, %arg1: i32) -> (i32, i32, i32) {
    %c0_i32 = arith.constant 0 : i32
    %c0_i32_0 = arith.constant 0 : i32
    %c0_i32_1 = arith.constant 0 : i32
    return %arg1, %c0_i32, %c0_i32_0 : i32, i32, i32
  }
  func.func @transform_5(%arg0: i32, %arg1: i32) -> (i32, i32, i32) {
    %c0_i32 = arith.constant 0 : i32
    %c0_i32_0 = arith.constant 0 : i32
    %c0_i32_1 = arith.constant 0 : i32
    return %arg1, %c0_i32, %c0_i32_0 : i32, i32, i32
  }
  func.func @transform_6(%arg0: i32, %arg1: i32) -> (i32, i32, i32) {
    %c0_i32 = arith.constant 0 : i32
    %c0_i32_0 = arith.constant 0 : i32
    %c0_i32_1 = arith.constant 0 : i32
    return %arg1, %c0_i32, %c0_i32_0 : i32, i32, i32
  }
  func.func @transform_7(%arg0: i32, %arg1: i32) -> (i32, i32, i32) {
    %c0_i32 = arith.constant 0 : i32
    %c0_i32_0 = arith.constant 0 : i32
    %c0_i32_1 = arith.constant 0 : i32
    return %arg1, %c0_i32, %c0_i32_0 : i32, i32, i32
  }
  func.func @transform_8(%arg0: i32, %arg1: i32) -> (i32, i32, i32) {
    %c0_i32 = arith.constant 0 : i32
    %c0_i32_0 = arith.constant 0 : i32
    %c0_i32_1 = arith.constant 0 : i32
    return %arg1, %c0_i32, %c0_i32_0 : i32, i32, i32
  }
  func.func @transform_9(%arg0: i32, %arg1: i32) -> (i32, i32, i32) {
    %c0_i32 = arith.constant 0 : i32
    %c0_i32_0 = arith.constant 0 : i32
    %c0_i32_1 = arith.constant 0 : i32
    return %arg1, %c0_i32, %c0_i32_0 : i32, i32, i32
  }
  func.func @transform_10(%arg0: i32, %arg1: i32) -> (i32, i32, i32) {
    %c0_i32 = arith.constant 0 : i32
    %c0_i32_0 = arith.constant 0 : i32
    %c0_i32_1 = arith.constant 0 : i32
    return %arg1, %c0_i32, %c0_i32_0 : i32, i32, i32
  }
  func.func @transform_11(%arg0: i32, %arg1: i32) -> (i32, i32) {
    %c0_i32 = arith.constant 0 : i32
    %c0_i32_0 = arith.constant 0 : i32
    %c0_i32_1 = arith.constant 0 : i32
    return %c0_i32, %c0_i32_0 : i32, i32
  }
  func.func @transform_12(%arg0: i32, %arg1: i32) -> (i32, i32, i32) {
    %c0_i32 = arith.constant 0 : i32
    %c0_i32_0 = arith.constant 0 : i32
    %c0_i32_1 = arith.constant 0 : i32
    return %arg0, %c0_i32, %c0_i32_0 : i32, i32, i32
  }
}

</mosaic_0001>

<bundles_post_ra>
// kernel: tpu_custom_call.1
= control target key start
LH: loop header
LB: loop body
LE: loop exit
PB: predicated region body
PF: predicated region fallthrough
CT: control target
= control target key end

     0   :  { %s2112_s0 = inlined_call_operand.hbm [shape: f32[2,1,8], index: 0, kind: input, shape index: {}]   ;;  %s2113_s1 = inlined_call_operand.vmem [shape: f32[2,8,32], index: 1, kind: input, shape index: {}]   ;;  %s2114_s2 = inlined_call_operand.vmem [shape: bf16[1,32,96], index: 2, kind: input, shape index: {}]   ;;  %s2115_s3 = inlined_call_operand.vmem [shape: f32[1,1,96], index: 3, kind: input, shape index: {}]   ;;  %s2116_s4 = inlined_call_operand.vmem [shape: bf16[1,32,32], index: 4, kind: input, shape index: {}]   ;;  %s2117_s5 = inlined_call_operand.vmem [shape: f32[1,1,32], index: 5, kind: input, shape index: {}]   ;;  %s2118_s6 = inlined_call_operand.hbm [shape: bf16[1,32,64], index: 6, kind: input, shape index: {}]   ;;  %s2119_s7 = inlined_call_operand.vmem [shape: f32[1,1,64], index: 7, kind: input, shape index: {}]   ;;  %s2120_s8 = inlined_call_operand.vmem [shape: bf16[1,64,32], index: 8, kind: input, shape index: {}]   ;;  %s2121_s9 = inlined_call_operand.vmem [shape: f32[1,1,32], index: 9, kind: input, shape index: {}]   ;;  %s2122_s10 = inlined_call_operand.vmem [shape: f32[1,4,32], index: 10, kind: input, shape index: {}]   ;;  %s2123_s11 = inlined_call_operand.vmem [shape: f32[2,32], index: 11, kind: input, shape index: {}]   ;;  %s2124_s12 = inlined_call_operand.hbm [shape: f32[2,8,32], index: 12, kind: output, shape index: {}]  }
   0x1   :  { %2133 = sst [smem:[#allocation15_spill]] %s2118_s6 }
   0x2   :  { %2134 = sst [smem:[#allocation16_spill]] %s2123_s11 }
   0x3   :  { %2135 = sst [smem:[#allocation17_spill]] %s2124_s12 }
   0x4   :  { %17 = vsyncpa [#allocation4], 0 }
   0x5   :  { %19 = vsyncpa [#allocation4 + $0x1], 0 }
   0x6   :  { %20 = vsyncpa [#allocation7], 0 }
   0x7   :  { %21 = vsyncpa [#allocation5], 0 }
   0x8   :  { %23 = vsyncpa [#allocation5 + $0x1], 0  ;;  %s1783_s21 = smov 0   ;;  %s1785_s22 = smov 0  }
   0x9   :  { %s1787_s23 = smov 0   ;;  %s1789_s24 = smov 0  }
   0xa   :  { %s1791_s25 = smov 0   ;;  %s1793_s26 = smov 0  }
   0xb LB: > { %2136 = sst [smem:[#allocation12_spill]] %s1687_s21  ;;  %s1349_s27 = sadd.s32 4294967295, %s1707_s26   ;;  %s1707_s26 = sphi %s1793_s26, %s29_s26   ;;  %s1703_s25 = sphi %s1791_s25, %s2163_s25   ;;  %s1699_s24 = sphi %s1789_s24, %s2162_s24   ;;  %s1695_s23 = sphi %s1787_s23, %s2161_s23   ;;  %s1691_s22 = sphi %s1785_s22, %s2160_s22   ;;  %s1687_s21 = sphi %s1783_s21, %s2159_s21  }
   0xc   : > { %s1350_s28 = sadd.s32 4294967294, %s1707_s26   ;;  %p61_p0 = scmp.ne.s32.totalorder %s1691_s22, %s1687_s21 }
   0xd   : > { %p1817_p1 = scmp.eq.s32.totalorder %s1349_s27, 0  ;;  %p1821_p2 = scmp.eq.s32.totalorder %s1349_s27, 1 }
   0xe   : > { %p372_p3 = scmp.eq.s32.totalorder %s1350_s28, 1  ;;  %p1351_p5 = scmp.ge.s32.totalorder %s1707_s26, 1 }
   0xf   : > { %s2137_s29 = scalar_select %p1817_p1, 1, 0 }
  0x10   : > { %s2138_s30 = scalar_select %p1821_p2, 1, 0 }
  0x11   : > { %p1827_p4 = por %p1817_p1, %p61_p0  ;;  %p1832_p6 = por %p372_p3, %p61_p0 }
  0x12   : > { %p379_p7 = scmp.lt.s32.totalorder %s1707_s26, 3  ;;  %s1709_s16 = smov [#allocation6]  }
  0x13   : > { %s2139_s13 = scalar_select %p1827_p4, 1, 0 }
  0x14   : > { %s2140_s14 = scalar_select %p1832_p6, 1, 0 }
  0x15   : > { %p1837_p8 = pnand %p1351_p5, %p379_p7  ;;  %s422_s17 = sshll.u32 %s1709_s16, 4  ;;  %s423_s17 = int_to_ptr.vmem [resolvable:$true] %s422_s17 }
  0x16   : > { %2141 = sst [smem:[#allocation13_spill]] %s2140_s14  ;;  %s41_s19 = sadd.s32 1, %s1703_s25 }
  0x17   : > { %s2142_s15 = scalar_select %p1837_p8, 1, 0 }
  0x18   : > { %p1466_p9 = pneg %p1837_p8  ;;  %s2144_s6 = sld [smem:[#allocation15_spill]] }
  0x1a   : > { %p1846_p11 = pnand %p1466_p9, %p1817_p1 }
  0x1c   : > { %p1565_p13 = pneg %p1846_p11 }
  0x1e   : > { %s1563_s28 = scalar_lea.hbm %s2144_s6, 256 }
  0x1f   : > { %p1564_p12 = scmp.ne.s32.totalorder %s2144_s6, %s1563_s28  ;;  %p1570_p5 = scmp.lt.u32.totalorder %s1563_s28, %s2144_s6 }
  0x21   : > { %p1566_p0 = pnand %p1565_p13, %p1564_p12 }
  0x23   : > { %p1567_p3 = pneg %p1566_p0 }
  0x25   : > { %p1572_p7 = pnand %p1570_p5, %p1567_p3 }
  0x27   : > { %1575 = shalt.err (!%p1572_p7)
}
  0x28   : > { %s1576_s11 = scalar_lea.vmem %s423_s17, 256  ;;  %p1584_p1 = scmp.lt.s32.totalorder %s423_s17, %s423_s17 }
  0x29   : > { %p1577_p9 = scmp.ne.s32.totalorder %s423_s17, %s1576_s11  ;;  %p1585_p4 = scmp.lt.s32.totalorder %s1576_s11, %s1576_s11 }
  0x2b   : > { %p1579_p10 = pnand %p1577_p9, %p1565_p13  ;;  %p1586_p8 = por %p1585_p4, %p1584_p1 }
  0x2d   : > { %p1580_p6 = pneg %p1579_p10 }
  0x2f   : > { %p1587_p2 = pnand %p1586_p8, %p1580_p6 }
  0x31   : > { %1590 = shalt.err (!%p1587_p2)
}
  0x32   : > { %s1710_s21 = smov 64   ;;  %s1711_s12 = smov 4  }
  0x33   : > { %1469 = dma.hbm_to_vmem [thread:$0]  (!%p1846_p11), %s2144_s6, 256, %s423_s17, [#allocation7], %s1710_s21, %s1710_s21, %s1711_s12  }
  0x34   : > { %p43_p1 = scmp.ge.s32.totalorder %s41_s19, 2  ;;  %p55_p2 = scmp.ne.s32.totalorder %s1695_s23, %s1691_s22 }
  0x35   : > { %p56_p4 = scmp.eq.s32.totalorder %s1707_s26, 0  ;;  %s48_s11 = sadd.s32 1, %s1695_s23 }
  0x36   : > { %s2165_s19 = smov (%p43_p1, %s41_s19), 0  ;;  %p2146_p6 = scmp.ne.s32.totalorder %s2138_s30, 0 }
  0x37   : > { %2145 = sst [smem:[#allocation14_spill]] %s2165_s19  ;;  %s45_s28 = ssub.s32 %s1703_s25, %s2165_s19 }
  0x38   : > { %p1875_p8 = por %p2146_p6, %p55_p2  ;;  %p57_p10 = por %p56_p4, %p55_p2 }
  0x39   : > { %p46_p12 = scmp.eq.s32.totalorder %s45_s28, 0  ;;  %s466_s18 = sand.u32 1, %s1695_s23  }
  0x3a   : > { %p1479_p13 = scmp.lt.s32.totalorder %s1707_s26, 2  ;;  %s1362_s17 = sshll.u32 %s1703_s25, 4 }
  0x3b   : > { %s1884_s16 = scalar_select %p46_p12, %s1695_s23, %s48_s11  }
  0x3c   : > { %s469_s21 = scalar_lea.vmem [#allocation3], %s466_s18  ;;  %s1890_s6 = scalar_lea.hbm %s2112_s0, %s1362_s17 }
  0x3d   : > { %s476_s12 = sshll.u32 %s469_s21, 4  ;;  %p1894_p11 = pnand %p1479_p13, %p57_p10  ;;  %s1892_s12 = int_to_ptr.vmem [resolvable:$true] %s476_s12 }
  0x3e   : > { %s467_s11 = scalar_lea.sflag [#allocation4], %s466_s18  ;;  %s1591_s28 = scalar_lea.hbm %s1890_s6, 16 }
  0x3f   : > { %p1592_p0 = scmp.ne.s32.totalorder %s1890_s6, %s1591_s28  ;;  %p1593_p3 = pneg %p1894_p11 }
  0x40   : > { %s1596_s14 = scalar_lea.hbm %s2112_s0, 32  ;;  %p1597_p9 = scmp.lt.u32.totalorder %s1890_s6, %s2112_s0 }
  0x41   : > { %p1594_p5 = pnand %p1593_p3, %p1592_p0  ;;  %p1598_p1 = scmp.lt.u32.totalorder %s1596_s14, %s1591_s28 }
  0x42   : > { %p1600_p4 = scmp.lt.u32.totalorder %s1591_s28, %s1890_s6 }
  0x43   : > { %p1595_p7 = pneg %p1594_p5  ;;  %p1599_p2 = por %p1598_p1, %p1597_p9 }
  0x45   : > { %p1601_p6 = por %p1600_p4, %p1599_p2 }
  0x47   : > { %p1602_p10 = pnand %p1601_p6, %p1595_p7 }
  0x49   : > { %1605 = shalt.err (!%p1602_p10)
}
  0x4a   : > { %s1606_s18 = scalar_lea.vmem %s1892_s12, 16  ;;  %s1712_s17 = smov [#allocation3]  }
  0x4b   : > { %p1607_p12 = scmp.ne.s32.totalorder %s1892_s12, %s1606_s18  ;;  %s1611_s21 = sshll.u32 %s1712_s17, 4  ;;  %s1612_s21 = int_to_ptr.vmem [resolvable:$false] %s1611_s21 }
  0x4c   : > { %s1613_s19 = scalar_lea.vmem %s1612_s21, 32  ;;  %p1614_p5 = scmp.lt.s32.totalorder %s1892_s12, %s1612_s21 }
  0x4d   : > { %p1609_p13 = pnand %p1607_p12, %p1593_p3  ;;  %p1615_p9 = scmp.lt.s32.totalorder %s1613_s19, %s1606_s18 }
  0x4f   : > { %p1610_p0 = pneg %p1609_p13  ;;  %p1616_p1 = por %p1615_p9, %p1614_p5 }
  0x51   : > { %p1617_p2 = pnand %p1616_p1, %p1610_p0 }
  0x53   : > { %1620 = shalt.err (!%p1617_p2)
}
  0x54   : > { %1473 = dma.hbm_to_vmem [thread:$0]  (!%p1894_p11), %s1890_s6, 16, %s1892_s12, %s467_s11  }
  0x55   : > { %p2149_p7 = scmp.ne.s32.totalorder %s2142_s15, 0 }
  0x56   : > { %s1926_s28 = sand.u32 (!%p2149_p7), 1, %s1691_s22   ;;  %p2150_p3 = scmp.ne.s32.totalorder (!%p2149_p7), %s2139_s13, 0 }
  0x57   : > { %492 = sbr.rel (%p2149_p7) target bundleno = 2842 (0xb1a), region = 68  ;;  %s495_s14 = scalar_lea.sflag (!%p2149_p7), [#allocation4], %s1926_s28 }
  0x58   : > { %s497_s20 = scalar_lea.vmem (!%p2149_p7), [#allocation3], %s1926_s28 }
  0x5e   : > { %1674 = dma.done.wait (%p2150_p3), %s495_s14, 16  }
  0x5f   : > { %1676 = vsyncadd (%p2150_p3), %s495_s14, 4294967280  ;;  %p2151_p4 = scmp.ne.s32.totalorder %s2137_s29, 0 }
  0x61   : > { %1678 = dma.done.wait (%p2151_p4), [#allocation7], 256  }
  0x62   : > { %1680 = vsyncadd (%p2151_p4), [#allocation7], 4294967040  ;;  %p576_p11 = scmp.lt.s32.totalorder %s1699_s24, 1  ;;  %vm617_vm0 = vcmask 261120   ;;  %v1537_v8 = vld [vmem:[%s2114_s2] sm:$0xff]   ;;  %v1713_v9 = vmov 0.0   ;;  %v667_v14 = vlaneseq }
  0x63   : > { %1410 = vmatprep.subr.bf16.mxu0 %v1713_v9  ;;  %vm1714_vm1 = vmmov 0   ;;  %v1538_v10 = vld [vmem:[%s2114_s2 + $0x8] sm:$0xff]   ;;  %1418 = vmatprep.subr.bf16.mxu1 %v1713_v9  ;;  %v1970_v22 = vld [vmem:[%s2122_s10] sm:$0xf]  ;;  %vm798_vm4 = vcmask 64512   ;;  %s1716_s12 = smov 64  }
  0x64   : > { %s577_s6 = scalar_select %p576_p11, %s1699_s24, 1  ;;  %1414 = vmatprep.mubr.msk.bf16.mxu0 %vm1714_vm1, %v1713_v9  ;;  %1411 = vmatpush3.bf16.msra.mxu0 %v1537_v8  ;;  %v1964_v18 = vshrl.u32 %v667_v14, 7  ;;  %v1367_v31 = vld [vmem:[%s2115_s3] ss:$0 sm:$0xff]  ;;  %v1540_v55 = vld [vmem:[%s2116_s4 + $0x8] sm:$0xff]   ;;  %vm816_vm5 = vcmask 1043456  }
  0x65   : > { %1412 = vmatprep.subr.bf16.mxu0 %v1713_v9  ;;  %1420 = vmatprep.mubr.msk.bf16.mxu1 %vm1714_vm1, %v1713_v9  ;;  %v1371_v42 = vld [vmem:[%s497_s20] ss:$0 sm:$0xff]  ;;  %vm1047_vm8 = vcmask 523264   ;;  %s2152_s21 = sld [smem:[#allocation16_spill]]  ;;  %s1365_s19 = sshll.u32 %s1926_s28, 3 }
  0x66   : > { %s1366_s15 = sshll.u32 %s577_s6, 3  ;;  %v669_v21 = vsub.s32 0, %v1964_v18  ;;  %v675_v24 = vsub.s32 1, %v1964_v18  ;;  %v1539_v54 = vld [vmem:[%s2116_s4] sm:$0xff]   ;;  %s1389_s14 = sshll.u32 %s1699_s24, 7 }
  0x67   : > { %s579_s11 = scalar_lea.vmem %s2113_s1, %s1366_s15  ;;  %s1715_s15 = smov 96  }
  0x68   : > { %v616_v0 = vld [vmem:[%s579_s11] sm:$0xff]  ;;  %1413 = vmatpush3.bf16.msra.mxu0 %v1538_v10  ;;  %v670_v23 = vrot.slane %v1970_v22, %v669_v21  ;;  %v676_v26 = vrot.slane %v1970_v22, %v675_v24  ;;  %s575_s6 = scalar_lea.vmem [#allocation8], %s1365_s19  ;;  %s2153_s30 = sld [smem:[#allocation17_spill]] }
  0x69   : > { %618 = vst.msk [vmem:[#allocation2] sm:$0xff] %vm617_vm0, %v616_v0  ;;  %1424 = vmatprep.subr.bf16.mxu0 %v1713_v9  ;;  %s1129_s29 = scalar_lea.sflag [#allocation5], %s1926_s28  ;;  %s1717_s24 = smov [#allocation8]  }
  0x6a   : > { %s1625_s18 = sshll.u32 %s1717_s24, 4  ;;  %s1626_s18 = int_to_ptr.vmem [resolvable:$false] %s1625_s18 }
  0x6b   : > { %s1627_s17 = scalar_lea.vmem %s1626_s18, 256 }
  0x6e   : > { %s2062_s11 = scalar_lea.hbm %s2153_s30, %s1389_s14 }
  0x70   : > { %v1944_v1 = vld [vmem:[#allocation2] sm:$0xff] }
  0x71   : > { %v647_v2 = vsel %vm617_vm0, %v1944_v1, 0.0 }
  0x72   : > { %648 = vadd.xlane.f32.xlu0 %v647_v2 }
  0xff   : > { %v649_v3 = vpop.xlane.xlu0 %648 }
 0x100   : > { %v651_v4 = vmul.f32 0.03125, %v649_v3 }
 0x102   : > { %v652_v5 = vsub.f32 %v1944_v1, %v651_v4  ;;  %v1374_v4 = vld [vmem:[%s2117_s5] ss:$0 sm:$0xff] }
 0x104   : > { %v653_v6 = vmul.f32 %v652_v5, %v652_v5  ;;  %v671_v25 = vmul.f32 %v670_v23, %v652_v5  ;;  %v1544_v23 = vld [vmem:[%s2120_s8 + $0x8] sm:$0xff]  }
 0x106   : > { %v654_v7 = vsel %vm617_vm0, %v653_v6, 0.0 }
 0x107   : > { %655 = vadd.xlane.f32.xlu0 %v654_v7 }
 0x194   : > { %v656_v11 = vpop.xlane.xlu0 %655 }
 0x195   : > { %v657_v12 = vmul.f32 0.032258064, %v656_v11 }
 0x197   : > { %1547 = vrsqrt.f32 %v657_v12  ;;  %vm660_vm2 = vcmp.eq.f32.partialorder %v657_v12, inf  ;;  %v663_v16 = vand.u32 2147483648, %v657_v12  ;;  %vm662_vm3 = vcmp.eq.f32.partialorder %v657_v12, 0.0 }
 0x1a1   : > { %v1548_v13 = vpop.eup %1547 }
 0x1a2   : > { %v659_v15 = vmul.f32 %v1548_v13, %v657_v12 }
 0x1a4   : > { %v661_v17 = vsel %vm660_vm2, %v657_v12, %v659_v15 }
 0x1a5   : > { %v664_v19 = vsel %vm662_vm3, %v663_v16, %v661_v17 }
 0x1a6   : > { %v665_v20 = vadd.f32 1e-06, %v664_v19  ;;  %v1541_v19 = vld [vmem:[#allocation6] sm:$0xff]  }
 0x1a8   : > { %1549 = vrcp.f32 %v665_v20  ;;  %v1542_v20 = vld [vmem:[#allocation6 + $0x8] sm:$0xff]  }
 0x1b2   : > { %v1550_v27 = vpop.eup %1549 }
 0x1b3   : > { %v672_v28 = vmul.f32 %v1550_v27, %v671_v25 }
 0x1b5   : > { %v677_v29 = vadd.f32 %v676_v26, %v672_v28 }
 0x1b7   : > { %v678_v30 = vpack.c.bf16 %v677_v29, %v677_v29 }
 0x1b9   : > { %1415 = vmatmul.mubr.msk.bf16.vlgmr.msra.gmra.mrb[0].mxu0 %vm617_vm0, %v678_v30 }
 0x1ba   : > { %1426 = vmatprep.mubr.msk.bf16.mxu0 %vm1714_vm1, %v1713_v9 }
 0x28c   : > { %v734_v32 = vpop.f32.mrb[0].mxu0 }
 0x28d   : > { %v735_v33 = vadd.f32 %v1367_v31, %v734_v32  ;;  %v1416_v34 = vpop.f32.mrb[1].mxu0 }
 0x28e   : > { %v737_v35 = vpop.f32.mrb[2].mxu0 }
 0x28f   : > { %v1417_v36 = vpop.f32.mrb[3].mxu0  ;;  %v742_v37 = vpack.c.bf16 %v735_v33, %v735_v33  ;;  %v740_v40 = vmul.f32 0.17677669, %v735_v33  ;;  %v944_v33 = vsub.s32 2, %v1964_v18  ;;  %v950_v35 = vsub.s32 3, %v1964_v18 }
 0x291   : > { %750 = vrot.lane.b32.xlu1 %v742_v37, %s1715_s15  ;;  %v741_v41 = vpack.c.bf16 %v740_v40, %v740_v40  ;;  %v945_v34 = vrot.slane %v1970_v22, %v944_v33  ;;  %s1142_s15 = sshll.u32 %s575_s6, 4  ;;  %s2064_s15 = int_to_ptr.vmem [resolvable:$true] %s1142_s15 }
 0x292   : > { %s1621_s13 = scalar_lea.vmem %s2064_s15, 128  ;;  %p1628_p13 = scmp.lt.s32.totalorder %s2064_s15, %s1626_s18 }
 0x293   : > { %p1622_p6 = scmp.ne.s32.totalorder %s2064_s15, %s1621_s13  ;;  %p1629_p0 = scmp.lt.s32.totalorder %s1627_s17, %s1621_s13 }
 0x295   : > { %p1623_p10 = pnand %p1622_p6, %p1875_p8  ;;  %p1630_p5 = por %p1629_p0, %p1628_p13 }
 0x297   : > { %p1624_p12 = pneg %p1623_p10 }
 0x299   : > { %p1631_p9 = pnand %p1630_p5, %p1624_p12 }
 0x303   : > { %v751_v38 = vpop.permute.xlu1 %750 }
 0x304   : > { %v756_v39 = vsel %vm617_vm0, %v751_v38, 0 }
 0x305   : > { %1419 = vmatpush3.bf16.xpose.msra.mxu1 %v756_v39 }
 0x306   : > { %1430 = vmatprep.subr.bf16.mxu1 %v1713_v9 }
 0x30c   : > { %1421 = vmatmul.mubr.msk.bf16.vlgmr.msra.gmra.mrb[0].mxu1 %vm617_vm0, %v741_v41 }
 0x30d   : > { %1434 = vmatprep.mubr.msk.bf16.mxu1 %vm1714_vm1, %v1713_v9  ;;  %1431 = vmatpush3.bf16.msra.mxu1 %v1539_v54 }
 0x30e   : > { %1432 = vmatprep.subr.bf16.mxu1 %v1713_v9 }
 0x311   : > { %1433 = vmatpush3.bf16.msra.mxu1 %v1540_v55 }
 0x312   : > { %1446 = vmatprep.subr.bf16.mxu1 %v1713_v9 }
 0x3df   : > { %v792_v43 = vpop.f32.mrb[0].mxu1 }
 0x3e0   : > { %v793_v44 = vadd.f32 %v1371_v42, %v792_v43  ;;  %v1422_v45 = vpop.f32.mrb[1].mxu1  ;;  %v1545_v42 = vld [vmem:[%s2120_s8 + $0x10] sm:$0xff]   ;;  %v1546_v43 = vld [vmem:[%s2120_s8 + $0x18] sm:$0xff]  }
 0x3e1   : > { %v795_v46 = vpop.f32.mrb[2].mxu1 }
 0x3e2   : > { %v1423_v47 = vpop.f32.mrb[3].mxu1  ;;  %v799_v48 = vsel %vm798_vm4, %v793_v44, -inf }
 0x3e3   : > { %800 = vmax.xlane.f32.xlu1 %v799_v48 }
 0x470   : > { %v801_v49 = vpop.xlane.xlu1 %800 }
 0x471   : > { %v802_v50 = vsub.f32 %v793_v44, %v801_v49 }
 0x473   : > { %v803_v51 = vmul.f32 1.442695, %v802_v50 }
 0x475   : > { %1551 = vpow2.f32 %v803_v51 }
 0x47f   : > { %v1552_v52 = vpop.eup %1551 }
 0x480   : > { %v805_v53 = vsel %vm798_vm4, %v1552_v52, 0.0 }
 0x481   : > { %806 = vadd.xlane.f32.xlu0 %v805_v53 }
 0x497   : > { %811 = vrot.lane.b32.xlu0 %v742_v37, %s1716_s12  ;;  %v951_v37 = vrot.slane %v1970_v22, %v950_v35  ;;  %v1378_v22 = vld [vmem:[%s2119_s7] ss:$0 sm:$0xff] }
 0x50e   : > { %v807_v56 = vpop.xlane.xlu0 %806 }
 0x50f   : > { %1553 = vrcp.f32 %v807_v56 }
 0x512   : > { %v812_v57 = vpop.permute.xlu0 %811 }
 0x513   : > { %v818_v58 = vsel %vm816_vm5, %v812_v57, 0 }
 0x514   : > { %1425 = vmatpush3.bf16.msra.mxu0 %v818_v58 }
 0x515   : > { %1438 = vmatprep.subr.bf16.mxu0 %v1713_v9 }
 0x519   : > { %v1554_v59 = vpop.eup %1553 }
 0x51a   : > { %v809_v60 = vmul.f32 %v1554_v59, %v1552_v52 }
 0x51c   : > { %v810_v61 = vpack.c.bf16 %v809_v60, %v809_v60 }
 0x51e   : > { %1427 = vmatmul.mubr.msk.bf16.vlgmr.msra.gmra.mrb[4].mxu0 %vm798_vm4, %v810_v61 }
 0x51f   : > { %1442 = vmatprep.mubr.msk.bf16.mxu0 %vm1714_vm1, %v1713_v9  ;;  %1439 = vmatpush3.bf16.msra.mxu0 %v1541_v19 }
 0x520   : > { %1440 = vmatprep.subr.bf16.mxu0 %v1713_v9 }
 0x523   : > { %1441 = vmatpush3.bf16.msra.mxu0 %v1542_v20 }
 0x5f1   : > { %v854_v62 = vpop.f32.mrb[4].mxu0 }
 0x5f2   : > { %v860_v63 = vpack.c.bf16 %v854_v62, %v854_v62  ;;  %v1428_v0 = vpop.f32.mrb[5].mxu0 }
 0x5f3   : > { %v857_v2 = vpop.f32.mrb[6].mxu0 }
 0x5f4   : > { %v1429_v3 = vpop.f32.mrb[7].mxu0  ;;  %1435 = vmatmul.mubr.msk.bf16.vlgmr.msra.gmra.mrb[4].mxu1 %vm617_vm0, %v860_v63 }
 0x5f5   : > { %1454 = vmatprep.mubr.msk.bf16.mxu1 %vm1714_vm1, %v1713_v9 }
 0x6c7   : > { %v916_v5 = vpop.f32.mrb[4].mxu1 }
 0x6c8   : > { %v917_v6 = vadd.f32 %v1374_v4, %v916_v5  ;;  %v1436_v7 = vpop.f32.mrb[5].mxu1 }
 0x6c9   : > { %v919_v8 = vpop.f32.mrb[6].mxu1 }
 0x6ca   : > { %v2013_v10 = vadd.f32 %v917_v6, %v1944_v1  ;;  %v1437_v11 = vpop.f32.mrb[7].mxu1  ;;  %v1543_v1 = vld [vmem:[%s2120_s8] sm:$0xff]  }
 0x6cb   : > { %1447 = vmatpush3.bf16.msra.mxu1 %v1543_v1  ;;  %v1096_v8 = vld [vmem:[%s2152_s21] sm:$0x3] }
 0x6cc   : > { %v923_v12 = vsel %vm617_vm0, %v2013_v10, 0.0  ;;  %1448 = vmatprep.subr.bf16.mxu1 %v1713_v9  ;;  %v1125_v11 = vrot.slane %v1096_v8, %v675_v24 }
 0x6cd   : > { %924 = vadd.xlane.f32.xlu0 %v923_v12 }
 0x6cf   : > { %1449 = vmatpush3.bf16.msra.mxu1 %v1544_v23 }
 0x6d0   : > { %1450 = vmatprep.subr.bf16.mxu1 %v1713_v9 }
 0x6d3   : > { %1451 = vmatpush3.bf16.msra.mxu1 %v1545_v42 }
 0x6d4   : > { %1452 = vmatprep.subr.bf16.mxu1 %v1713_v9  ;;  %v1382_v9 = vld [vmem:[%s2121_s9] ss:$0 sm:$0xff] }
 0x6d7   : > { %1453 = vmatpush3.bf16.msra.mxu1 %v1546_v43 }
 0x75a   : > { %v925_v13 = vpop.xlane.xlu0 %924 }
 0x75b   : > { %v926_v14 = vmul.f32 0.03125, %v925_v13 }
 0x75d   : > { %v927_v15 = vsub.f32 %v2013_v10, %v926_v14 }
 0x75f   : > { %v928_v16 = vmul.f32 %v927_v15, %v927_v15  ;;  %v946_v36 = vmul.f32 %v945_v34, %v927_v15 }
 0x761   : > { %v929_v17 = vsel %vm617_vm0, %v928_v16, 0.0 }
 0x762   : > { %930 = vadd.xlane.f32.xlu1 %v929_v17 }
 0x7ef   : > { %v931_v25 = vpop.xlane.xlu1 %930 }
 0x7f0   : > { %v932_v26 = vmul.f32 0.032258064, %v931_v25 }
 0x7f2   : > { %1555 = vrsqrt.f32 %v932_v26  ;;  %vm935_vm6 = vcmp.eq.f32.partialorder %v932_v26, inf  ;;  %v938_v29 = vand.u32 2147483648, %v932_v26  ;;  %vm937_vm7 = vcmp.eq.f32.partialorder %v932_v26, 0.0 }
 0x7fc   : > { %v1556_v27 = vpop.eup %1555 }
 0x7fd   : > { %v934_v28 = vmul.f32 %v1556_v27, %v932_v26 }
 0x7ff   : > { %v936_v30 = vsel %vm935_vm6, %v932_v26, %v934_v28 }
 0x800   : > { %v939_v31 = vsel %vm937_vm7, %v938_v29, %v936_v30 }
 0x801   : > { %v940_v32 = vadd.f32 1e-06, %v939_v31 }
 0x803   : > { %1557 = vrcp.f32 %v940_v32 }
 0x80d   : > { %v1558_v38 = vpop.eup %1557 }
 0x80e   : > { %v947_v39 = vmul.f32 %v1558_v38, %v946_v36 }
 0x810   : > { %v952_v40 = vadd.f32 %v951_v37, %v947_v39 }
 0x812   : > { %v953_v41 = vpack.c.bf16 %v952_v40, %v952_v40 }
 0x814   : > { %1443 = vmatmul.mubr.msk.bf16.vlgmr.msra.gmra.mrb[8].mxu0 %vm617_vm0, %v953_v41 }
 0x8e7   : > { %v1009_v44 = vpop.f32.mrb[8].mxu0 }
 0x8e8   : > { %v1010_v45 = vadd.f32 %v1378_v22, %v1009_v44  ;;  %v1444_v46 = vpop.f32.mrb[9].mxu0 }
 0x8e9   : > { %v1012_v47 = vpop.f32.mrb[10].mxu0 }
 0x8ea   : > { %v1015_v48 = vmax.f32 %v1010_v45, 0.0  ;;  %v1445_v49 = vpop.f32.mrb[11].mxu0 }
 0x8ec   : > { %v1016_v50 = vpack.c.bf16 %v1015_v48, %v1015_v48 }
 0x8ee   : > { %1455 = vmatmul.mubr.msk.bf16.vlgmr.msra.gmra.mrb[8].mxu1 %vm1047_vm8, %v1016_v50 }
 0x9c1   : > { %v1085_v51 = vpop.f32.mrb[8].mxu1 }
 0x9c2   : > { %v1086_v52 = vadd.f32 %v1382_v9, %v1085_v51  ;;  %v1456_v53 = vpop.f32.mrb[9].mxu1 }
 0x9c3   : > { %v1088_v54 = vpop.f32.mrb[10].mxu1 }
 0x9c4   : > { %v1091_v55 = vadd.f32 %v1086_v52, %v2013_v10  ;;  %v1457_v56 = vpop.f32.mrb[11].mxu1  ;;  %v1119_v10 = vrot.slane %v1096_v8, %v669_v21 }
 0x9c6   : > { %1092 = vst.msk [vmem:[#allocation2] sm:$0xff] %vm617_vm0, %v1091_v55  ;;  %v1097_v57 = vsel %vm617_vm0, %v1091_v55, 0.0 }
 0x9c7   : > { %1098 = vadd.xlane.f32.xlu1 %v1097_v57 }
 0xa54   : > { %v1099_v58 = vpop.xlane.xlu1 %1098 }
 0xa55   : > { %v1100_v59 = vmul.f32 0.03125, %v1099_v58 }
 0xa57   : > { %v1101_v60 = vsub.f32 %v1091_v55, %v1100_v59 }
 0xa59   : > { %v1102_v61 = vmul.f32 %v1101_v60, %v1101_v60  ;;  %v1120_v12 = vmul.f32 %v1119_v10, %v1101_v60 }
 0xa5b   : > { %v1103_v62 = vsel %vm617_vm0, %v1102_v61, 0.0 }
 0xa5c   : > { %1104 = vadd.xlane.f32.xlu1 %v1103_v62 }
 0xae9   : > { %v1105_v63 = vpop.xlane.xlu1 %1104 }
 0xaea   : > { %v1106_v0 = vmul.f32 0.032258064, %v1105_v63 }
 0xaec   : > { %1559 = vrsqrt.f32 %v1106_v0  ;;  %vm1109_vm9 = vcmp.eq.f32.partialorder %v1106_v0, inf  ;;  %v1112_v4 = vand.u32 2147483648, %v1106_v0  ;;  %vm1111_vm10 = vcmp.eq.f32.partialorder %v1106_v0, 0.0 }
 0xaf6   : > { %v1560_v2 = vpop.eup %1559 }
 0xaf7   : > { %v1108_v3 = vmul.f32 %v1560_v2, %v1106_v0 }
 0xaf9   : > { %v1110_v5 = vsel %vm1109_vm9, %v1106_v0, %v1108_v3 }
 0xafa   : > { %v1113_v6 = vsel %vm1111_vm10, %v1112_v4, %v1110_v5 }
 0xafb   : > { %v1114_v7 = vadd.f32 1e-06, %v1113_v6 }
 0xafd   : > { %1561 = vrcp.f32 %v1114_v7 }
 0xb07   : > { %v1562_v13 = vpop.eup %1561 }
 0xb08   : > { %v1121_v14 = vmul.f32 %v1562_v13, %v1120_v12 }
 0xb0a   : > { %v1126_v15 = vadd.f32 %v1125_v11, %v1121_v14 }
 0xb0c   : > { %1127 = vst.msk [vmem:[%s575_s6] sm:$0xff] %vm617_vm0, %v1126_v15 }
 0xb0d   : > { %1634 = shalt.err (!%p1631_p9)
}
 0xb0e   : > { %s1635_s28 = scalar_lea.hbm %s2062_s11, 128  ;;  %s1639_s14 = scalar_lea.hbm %s2153_s30, 256 }
 0xb0f   : > { %p1636_p1 = scmp.ne.s32.totalorder %s2062_s11, %s1635_s28  ;;  %p1640_p3 = scmp.lt.u32.totalorder %s2062_s11, %s2153_s30 }
 0xb10   : > { %p1641_p4 = scmp.lt.u32.totalorder %s1639_s14, %s1635_s28  ;;  %p1643_p6 = scmp.lt.u32.totalorder %s1635_s28, %s2062_s11 }
 0xb11   : > { %p1637_p2 = pnand %p1636_p1, %p1875_p8 }
 0xb12   : > { %p1642_p11 = por %p1641_p4, %p1640_p3 }
 0xb13   : > { %p1638_p7 = pneg %p1637_p2 }
 0xb14   : > { %p1644_p10 = por %p1643_p6, %p1642_p11 }
 0xb16   : > { %p1645_p12 = pnand %p1644_p10, %p1638_p7 }
 0xb18   : > { %1648 = shalt.err (!%p1645_p12)
}
 0xb19   : > { %1464 = dma.vmem_to_hbm [thread:$0]  (%p1875_p8), %s2064_s15, 128, %s2062_s11, %s1129_s29  }
 0xb1a PF: > { %s2154_s20 = sld [smem:[#allocation12_spill]]  ;;  %s2155_s13 = sld [smem:[#allocation13_spill]] }
 0xb1b   : > { %p2157_p0 = scmp.ge.s32.totalorder %s1707_s26, 2 }
 0xb20   : > { %s1154_s24 = sand.u32 1, %s2154_s20   ;;  %p2156_p13 = scmp.ne.s32.totalorder %s2155_s13, 0 }
 0xb21   : > { %s1155_s18 = scalar_lea.sflag [#allocation5], %s1154_s24 }
 0xb22   : > { %p1475_p5 = pnand %p2157_p0, %p2156_p13 }
 0xb24   : > { %1682 = dma.done.wait (!%p1475_p5), %s1155_s18, 128  }
 0xb25   : > { %1684 = vsyncadd (!%p1475_p5), %s1155_s18, 4294967168  ;;  %s29_s26 = sadd.s32 1, %s1707_s26   ;;  %s2158_s27 = sld [smem:[#allocation14_spill]] }
 0xb26   : > { %p26_p9 = scmp.ge.s32.totalorder %s29_s26, 4   ;;  %s2159_s21 = smov %s1691_s22 }
 0xb27   : > { %s2160_s22 = smov %s1695_s23  ;;  %s2161_s23 = smov %s1884_s16 }
 0xb28   : > { %s2162_s24 = smov %s1703_s25  ;;  %28 = sbr.rel (!%p26_p9) target bundleno = 11 (0xb), region = 153 }
 0xb2b   : > { %s2163_s25 = smov %s2158_s27 }
 0xb2f   :  { %1160 = vsyncpa [#allocation4], 1 }
 0xb30   :  { %1162 = vsyncpa [#allocation4 + $0x1], 1 }
 0xb31   :  { %1163 = vsyncpa [#allocation7], 1 }
 0xb32   :  { %1164 = vsyncpa [#allocation5], 1 }
 0xb33   :  { %1166 = vsyncpa [#allocation5 + $0x1], 1 }

</bundles_post_ra>
